<compile_context>
chip_gen: v5e
topology: v5e:2x2
jax: 0.10.0
libtpu: 0.0.40
codegen_flags: <defaults>
</compile_context>

<pallas_src>
import jax
import jax.numpy as jnp
from jax.experimental import pallas as pl
from jax.experimental.pallas import tpu as pltpu

IN_FEAT = 2
HIDDEN = 100
HIDDEN_PAD = 128          # hidden dim padded to one lane-width (zeros beyond 100)
MAX_TILE = 512            # batch rows per grid step


def _round_up(a, b):
    return ((a + b - 1) // b) * b


def _mine_kernel(n_ref,                                  # SMEM scalar prefetch: [n_valid]
                 x_ref, y_ref, yp_ref,                   # (TILE, 1) batch tiles
                 w1_ref, b1_ref, w2_ref, b2_ref,         # params (padded to 128 lanes)
                 out_ref,                                # (1, 1) loss
                 sumj_ref, sume_ref):                    # (1, 1) VMEM accumulators
    i = pl.program_id(0)
    last = pl.num_programs(0) - 1
    tile = x_ref.shape[0]

    @pl.when(i == 0)
    def _init():
        sumj_ref[...] = jnp.zeros_like(sumj_ref)
        sume_ref[...] = jnp.zeros_like(sume_ref)

    x = x_ref[...]                       # (TILE, 1)
    y_j = y_ref[...]                     # (TILE, 1)
    y_m = yp_ref[...]                    # (TILE, 1)  y[perm]
    w1_r0 = w1_ref[0:1, :]               # (1, 128)
    w1_r1 = w1_ref[1:2, :]               # (1, 128)
    b1 = b1_ref[...]                     # (1, 128)
    w2 = w2_ref[...]                     # (1, 128)
    b2 = b2_ref[...]                     # (1, 1)

    # Layer 1 on the VPU: rank-1 broadcasts; x*W1[0] shared by both branches.
    xw = x * w1_r0                                        # (TILE, 128)
    h_j = jnp.maximum(xw + y_j * w1_r1 + b1, 0.0)         # ReLU
    h_m = jnp.maximum(xw + y_m * w1_r1 + b1, 0.0)

    # Layer 2: multiply by the W2 column and lane-reduce (XLU), no MXU drain.
    t_j = jnp.sum(h_j * w2, axis=-1, keepdims=True) + b2  # (TILE, 1)
    t_m = jnp.sum(h_m * w2, axis=-1, keepdims=True) + b2
    e_m = jnp.exp(t_m)

    @pl.when(i != last)
    def _accumulate_interior():
        sumj_ref[...] += jnp.sum(t_j, axis=0, keepdims=True)
        sume_ref[...] += jnp.sum(e_m, axis=0, keepdims=True)

    @pl.when(i == last)
    def _accumulate_masked_and_finalize():
        # Only the last tile can contain padded rows -> mask only here.
        row = jax.lax.broadcasted_iota(jnp.int32, (tile, 1), 0) + i * tile
        valid = row < n_ref[0]
        sumj_ref[...] += jnp.sum(jnp.where(valid, t_j, 0.0), axis=0, keepdims=True)
        sume_ref[...] += jnp.sum(jnp.where(valid, e_m, 0.0), axis=0, keepdims=True)

        n_f = n_ref[0].astype(jnp.float32)
        mean_j = sumj_ref[...] / n_f
        mean_e = sume_ref[...] / n_f
        mi = mean_j - jnp.log(mean_e)
        out_ref[...] = (-mi).astype(out_ref.dtype)


def init_mine_params(key):
    """Deterministic init matching nn.Linear default uniform(-1/sqrt(fan_in), ...)."""
    k1, k2, k3, k4 = jax.random.split(key, 4)
    lim1 = 1.0 / (IN_FEAT ** 0.5)
    lim2 = 1.0 / (HIDDEN ** 0.5)
    w1 = jax.random.uniform(k1, (IN_FEAT, HIDDEN), jnp.float32, -lim1, lim1)
    b1 = jax.random.uniform(k2, (HIDDEN,), jnp.float32, -lim1, lim1)
    w2 = jax.random.uniform(k3, (HIDDEN, 1), jnp.float32, -lim2, lim2)
    b2 = jax.random.uniform(k4, (1,), jnp.float32, -lim2, lim2)
    return w1, b1, w2, b2


def mine_forward(x, y, params, perm_key):
    """x, y: (N, 1) float32. Returns scalar loss = -MI estimate."""
    n = x.shape[0]
    # torch.randperm equivalent (host-side glue, not in the kernel).
    perm = jax.random.permutation(perm_key, n)
    y_perm = jnp.take(y, perm, axis=0)

    w1, b1, w2, b2 = params
    # Pad params to lane width (tiny one-time cost; zeros beyond HIDDEN are inert).
    w1_p = jnp.zeros((IN_FEAT, HIDDEN_PAD), jnp.float32).at[:, :HIDDEN].set(w1)
    b1_p = jnp.zeros((1, HIDDEN_PAD), jnp.float32).at[0, :HIDDEN].set(b1)
    w2_p = jnp.zeros((1, HIDDEN_PAD), jnp.float32).at[0, :HIDDEN].set(w2[:, 0])
    b2_p = b2.reshape(1, 1).astype(jnp.float32)

    # Batch tiling: up to MAX_TILE rows per grid step, sublane-aligned.
    tile = min(MAX_TILE, _round_up(n, 8))
    n_pad = _round_up(n, tile)
    grid = n_pad // tile

    def as_col(a):
        a = a.astype(jnp.float32).reshape(-1, 1)
        if n_pad != n:
            a = jnp.pad(a, ((0, n_pad - n), (0, 0)))
        return a

    xp, yp, ypp = as_col(x), as_col(y), as_col(y_perm)
    n_arr = jnp.array([n], jnp.int32)   # SMEM scalar: valid row count

    out = pl.pallas_call(
        _mine_kernel,
        out_shape=jax.ShapeDtypeStruct((1, 1), jnp.float32),
        grid_spec=pltpu.PrefetchScalarGridSpec(
            num_scalar_prefetch=1,
            grid=(grid,),
            in_specs=[
                pl.BlockSpec((tile, 1), lambda i, n_ref: (i, 0)),          # x
                pl.BlockSpec((tile, 1), lambda i, n_ref: (i, 0)),          # y
                pl.BlockSpec((tile, 1), lambda i, n_ref: (i, 0)),          # y[perm]
                pl.BlockSpec((IN_FEAT, HIDDEN_PAD), lambda i, n_ref: (0, 0)),  # W1
                pl.BlockSpec((1, HIDDEN_PAD), lambda i, n_ref: (0, 0)),    # b1
                pl.BlockSpec((1, HIDDEN_PAD), lambda i, n_ref: (0, 0)),    # W2 col
                pl.BlockSpec((1, 1), lambda i, n_ref: (0, 0)),             # b2
            ],
            out_specs=pl.BlockSpec((1, 1), lambda i, n_ref: (0, 0)),
            scratch_shapes=[pltpu.VMEM((1, 1), jnp.float32),   # sum t_joint
                            pltpu.VMEM((1, 1), jnp.float32)],  # sum exp(t_marg)
        ),
        compiler_params=pltpu.CompilerParams(
            dimension_semantics=("arbitrary",),        # carried reduction
            vmem_limit_bytes=32 * 1024 * 1024,         # safe on v5e/v6e/v7x
        ),
    )(n_arr, xp, yp, ypp, w1_p, b1_p, w2_p, b2_p)
    return out[0, 0]


def _reference_loss(x, y, params, perm_key):
    """Pure-JAX reference (same math as the PyTorch module)."""
    n = x.shape[0]
    perm = jax.random.permutation(perm_key, n)
    w1, b1, w2, b2 = params
    hp = jax.lax.Precision.HIGHEST

    def net(inp):
        h = jnp.maximum(jnp.dot(inp, w1, precision=hp) + b1, 0.0)
        return jnp.dot(h, w2, precision=hp) + b2

    joint = jnp.concatenate([x, y], axis=1)
    marginal = jnp.concatenate([x, y[perm]], axis=1)
    mi = jnp.mean(net(joint)) - jnp.log(jnp.mean(jnp.exp(net(marginal))))
    return -mi


if __name__ == "__main__":
    key = jax.random.PRNGKey(0)
    kx, ky, kperm, kx2, ky2, kperm2 = jax.random.split(key, 6)
    params = init_mine_params(jax.random.PRNGKey(1))

    # Small case: single tile, no padding.
    N = 8
    x = jax.random.normal(kx, (N, 1), jnp.float32)
    y = jax.random.normal(ky, (N, 1), jnp.float32)
    loss = mine_forward(x, y, params, kperm)
    jax.block_until_ready(loss)
    ref = _reference_loss(x, y, params, kperm)
    assert jnp.allclose(loss, ref, atol=1e-4, rtol=1e-4), (loss, ref)

    # Larger case: exercises multi-tile grid + last-tile masking path.
    N2 = 1000
    x2 = jax.random.normal(kx2, (N2, 1), jnp.float32)
    y2 = jax.random.normal(ky2, (N2, 1), jnp.float32)
    loss2 = mine_forward(x2, y2, params, kperm2)
    jax.block_until_ready(loss2)
    ref2 = _reference_loss(x2, y2, params, kperm2)
    assert jnp.allclose(loss2, ref2, atol=1e-4, rtol=1e-4), (loss2, ref2)

    print("KERNEL_OK")
</pallas_src>

<mosaic_0001>
module attributes {stable_mosaic.version = 11 : i64} {
  func.func @_mine_kernel(%arg0: i32, %arg1: memref<1xi32, #tpu.memory_space<smem>>, %arg2: memref<8x1xf32, #tpu.memory_space<vmem>>, %arg3: memref<8x1xf32, #tpu.memory_space<vmem>>, %arg4: memref<8x1xf32, #tpu.memory_space<vmem>>, %arg5: memref<2x128xf32, #tpu.memory_space<vmem>>, %arg6: memref<1x128xf32, #tpu.memory_space<vmem>>, %arg7: memref<1x128xf32, #tpu.memory_space<vmem>>, %arg8: memref<1x1xf32, #tpu.memory_space<vmem>>, %arg9: memref<1x1xf32, #tpu.memory_space<vmem>>, %arg10: memref<1x1xf32, #tpu.memory_space<vmem>>, %arg11: memref<1x1xf32, #tpu.memory_space<vmem>>) attributes {dimension_semantics = [#tpu.dimension_semantics<arbitrary>], iteration_bounds = array<i64: 1>, scalar_prefetch = 1 : i64, scratch_operands = 2 : i64, tpu.core_type = #tpu.core_type<tc>, window_params = [{transform_indices = @transform_0, window_bounds = array<i64: 8, 1>}, {transform_indices = @transform_1, window_bounds = array<i64: 8, 1>}, {transform_indices = @transform_2, window_bounds = array<i64: 8, 1>}, {pipeline_mode = #tpu.pipeline_mode<synchronous>, transform_indices = @transform_3, window_bounds = array<i64: 2, 128>}, {pipeline_mode = #tpu.pipeline_mode<synchronous>, transform_indices = @transform_4, window_bounds = array<i64: 1, 128>}, {pipeline_mode = #tpu.pipeline_mode<synchronous>, transform_indices = @transform_5, window_bounds = array<i64: 1, 128>}, {pipeline_mode = #tpu.pipeline_mode<synchronous>, transform_indices = @transform_6, window_bounds = array<i64: 1, 1>}, {pipeline_mode = #tpu.pipeline_mode<synchronous>, transform_indices = @transform_7, window_bounds = array<i64: 1, 1>}]} {
    %c0_i32 = arith.constant 0 : i32
    %0 = arith.cmpi eq, %arg0, %c0_i32 : i32
    %1 = arith.extui %0 : i1 to i32
    %c0_i32_0 = arith.constant 0 : i32
    %2 = arith.cmpi ne, %1, %c0_i32_0 : i32
    scf.if %2 {
      %cst_22 = arith.constant 0.000000e+00 : f32
      %49 = vector.broadcast %cst_22 : f32 to vector<1x1xf32>
      %c0_23 = arith.constant 0 : index
      %c0_24 = arith.constant 0 : index
      %50 = vector.load %arg10[%c0_23, %c0_24] : memref<1x1xf32, #tpu.memory_space<vmem>>, vector<1x1xf32>
      tpu.vector_store %arg10[%c0_23, %c0_24], %49 {strides = array<i32>} : memref<1x1xf32, #tpu.memory_space<vmem>>, vector<1x1xf32>,
      %cst_25 = arith.constant 0.000000e+00 : f32
      %51 = vector.broadcast %cst_25 : f32 to vector<1x1xf32>
      %c0_26 = arith.constant 0 : index
      %c0_27 = arith.constant 0 : index
      %52 = vector.load %arg11[%c0_26, %c0_27] : memref<1x1xf32, #tpu.memory_space<vmem>>, vector<1x1xf32>
      tpu.vector_store %arg11[%c0_26, %c0_27], %51 {strides = array<i32>} : memref<1x1xf32, #tpu.memory_space<vmem>>, vector<1x1xf32>,
    } else {
    }
    %c0 = arith.constant 0 : index
    %c0_1 = arith.constant 0 : index
    %3 = vector.load %arg2[%c0, %c0_1] : memref<8x1xf32, #tpu.memory_space<vmem>>, vector<8x1xf32>
    %c0_2 = arith.constant 0 : index
    %c0_3 = arith.constant 0 : index
    %4 = vector.load %arg3[%c0_2, %c0_3] : memref<8x1xf32, #tpu.memory_space<vmem>>, vector<8x1xf32>
    %c0_4 = arith.constant 0 : index
    %c0_5 = arith.constant 0 : index
    %5 = vector.load %arg4[%c0_4, %c0_5] : memref<8x1xf32, #tpu.memory_space<vmem>>, vector<8x1xf32>
    %c0_6 = arith.constant 0 : index
    %c0_7 = arith.constant 0 : index
    %6 = vector.load %arg5[%c0_6, %c0_7] : memref<2x128xf32, #tpu.memory_space<vmem>>, vector<1x128xf32>
    %c1 = arith.constant 1 : index
    %c0_8 = arith.constant 0 : index
    %7 = vector.load %arg5[%c1, %c0_8] : memref<2x128xf32, #tpu.memory_space<vmem>>, vector<1x128xf32>
    %c0_9 = arith.constant 0 : index
    %c0_10 = arith.constant 0 : index
    %8 = vector.load %arg6[%c0_9, %c0_10] : memref<1x128xf32, #tpu.memory_space<vmem>>, vector<1x128xf32>
    %c0_11 = arith.constant 0 : index
    %c0_12 = arith.constant 0 : index
    %9 = vector.load %arg7[%c0_11, %c0_12] : memref<1x128xf32, #tpu.memory_space<vmem>>, vector<1x128xf32>
    %c0_13 = arith.constant 0 : index
    %c0_14 = arith.constant 0 : index
    %10 = vector.load %arg8[%c0_13, %c0_14] : memref<1x1xf32, #tpu.memory_space<vmem>>, vector<1x1xf32>
    %11 = vector.broadcast %3 : vector<8x1xf32> to vector<8x128xf32>
    %12 = vector.broadcast %6 : vector<1x128xf32> to vector<8x128xf32>
    %13 = arith.mulf %11, %12 : vector<8x128xf32>
    %14 = vector.broadcast %4 : vector<8x1xf32> to vector<8x128xf32>
    %15 = vector.broadcast %7 : vector<1x128xf32> to vector<8x128xf32>
    %16 = arith.mulf %14, %15 : vector<8x128xf32>
    %17 = arith.addf %13, %16 : vector<8x128xf32>
    %18 = vector.broadcast %8 : vector<1x128xf32> to vector<8x128xf32>
    %19 = arith.addf %17, %18 : vector<8x128xf32>
    %cst = arith.constant 0.000000e+00 : f32
    %20 = vector.broadcast %cst : f32 to vector<8x128xf32>
    %21 = arith.maximumf %19, %20 : vector<8x128xf32>
    %22 = vector.broadcast %5 : vector<8x1xf32> to vector<8x128xf32>
    %23 = vector.broadcast %7 : vector<1x128xf32> to vector<8x128xf32>
    %24 = arith.mulf %22, %23 : vector<8x128xf32>
    %25 = arith.addf %13, %24 : vector<8x128xf32>
    %26 = vector.broadcast %8 : vector<1x128xf32> to vector<8x128xf32>
    %27 = arith.addf %25, %26 : vector<8x128xf32>
    %cst_15 = arith.constant 0.000000e+00 : f32
    %28 = vector.broadcast %cst_15 : f32 to vector<8x128xf32>
    %29 = arith.maximumf %27, %28 : vector<8x128xf32>
    %30 = vector.broadcast %9 : vector<1x128xf32> to vector<8x128xf32>
    %31 = arith.mulf %21, %30 : vector<8x128xf32>
    %cst_16 = arith.constant dense<0.000000e+00> : vector<8xf32>
    %32 = vector.multi_reduction <add>, %31, %cst_16 [1] : vector<8x128xf32> to vector<8xf32>
    %33 = vector.shape_cast %32 : vector<8xf32> to vector<8x1xf32>
    %34 = vector.broadcast %10 : vector<1x1xf32> to vector<8x1xf32>
    %35 = arith.addf %33, %34 : vector<8x1xf32>
    %36 = vector.broadcast %9 : vector<1x128xf32> to vector<8x128xf32>
    %37 = arith.mulf %29, %36 : vector<8x128xf32>
    %cst_17 = arith.constant dense<0.000000e+00> : vector<8xf32>
    %38 = vector.multi_reduction <add>, %37, %cst_17 [1] : vector<8x128xf32> to vector<8xf32>
    %39 = vector.shape_cast %38 : vector<8xf32> to vector<8x1xf32>
    %40 = vector.broadcast %10 : vector<1x1xf32> to vector<8x1xf32>
    %41 = arith.addf %39, %40 : vector<8x1xf32>
    %42 = math.exp %41 : vector<8x1xf32>
    %c0_i32_18 = arith.constant 0 : i32
    %43 = arith.cmpi ne, %arg0, %c0_i32_18 : i32
    %44 = arith.extui %43 : i1 to i32
    %c0_i32_19 = arith.constant 0 : i32
    %45 = arith.cmpi ne, %44, %c0_i32_19 : i32
    scf.if %45 {
      %c0_22 = arith.constant 0 : index
      %c0_23 = arith.constant 0 : index
      %49 = vector.load %arg10[%c0_22, %c0_23] : memref<1x1xf32, #tpu.memory_space<vmem>>, vector<1x1xf32>
      %cst_24 = arith.constant dense<0.000000e+00> : vector<1xf32>
      %50 = vector.multi_reduction <add>, %35, %cst_24 [0] : vector<8x1xf32> to vector<1xf32>
      %51 = vector.shape_cast %50 : vector<1xf32> to vector<1x1xf32>
      %52 = arith.addf %49, %51 : vector<1x1xf32>
      %c0_25 = arith.constant 0 : index
      %c0_26 = arith.constant 0 : index
      %53 = vector.load %arg10[%c0_25, %c0_26] : memref<1x1xf32, #tpu.memory_space<vmem>>, vector<1x1xf32>
      tpu.vector_store %arg10[%c0_25, %c0_26], %52 {strides = array<i32>} : memref<1x1xf32, #tpu.memory_space<vmem>>, vector<1x1xf32>,
      %c0_27 = arith.constant 0 : index
      %c0_28 = arith.constant 0 : index
      %54 = vector.load %arg11[%c0_27, %c0_28] : memref<1x1xf32, #tpu.memory_space<vmem>>, vector<1x1xf32>
      %cst_29 = arith.constant dense<0.000000e+00> : vector<1xf32>
      %55 = vector.multi_reduction <add>, %42, %cst_29 [0] : vector<8x1xf32> to vector<1xf32>
      %56 = vector.shape_cast %55 : vector<1xf32> to vector<1x1xf32>
      %57 = arith.addf %54, %56 : vector<1x1xf32>
      %c0_30 = arith.constant 0 : index
      %c0_31 = arith.constant 0 : index
      %58 = vector.load %arg11[%c0_30, %c0_31] : memref<1x1xf32, #tpu.memory_space<vmem>>, vector<1x1xf32>
      tpu.vector_store %arg11[%c0_30, %c0_31], %57 {strides = array<i32>} : memref<1x1xf32, #tpu.memory_space<vmem>>, vector<1x1xf32>,
    } else {
    }
    %c0_i32_20 = arith.constant 0 : i32
    %46 = arith.cmpi eq, %arg0, %c0_i32_20 : i32
    %47 = arith.extui %46 : i1 to i32
    %c0_i32_21 = arith.constant 0 : i32
    %48 = arith.cmpi ne, %47, %c0_i32_21 : i32
    scf.if %48 {
      %49 = tpu.iota {dimensions = array<i32: 0>} : vector<8x1xi32>
      %c8_i32 = arith.constant 8 : i32
      %50 = arith.muli %arg0, %c8_i32 : i32
      %51 = vector.broadcast %50 : i32 to vector<8x1xi32>
      %52 = arith.addi %49, %51 : vector<8x1xi32>
      %c0_22 = arith.constant 0 : index
      %53 = memref.load %arg1[%c0_22] : memref<1xi32, #tpu.memory_space<smem>>
      %54 = vector.broadcast %53 : i32 to vector<8x1xi32>
      %55 = arith.cmpi slt, %52, %54 : vector<8x1xi32>
      %c0_23 = arith.constant 0 : index
      %c0_24 = arith.constant 0 : index
      %56 = vector.load %arg10[%c0_23, %c0_24] : memref<1x1xf32, #tpu.memory_space<vmem>>, vector<1x1xf32>
      %cst_25 = arith.constant 0.000000e+00 : f32
      %57 = vector.broadcast %cst_25 : f32 to vector<8x1xf32>
      %58 = arith.select %55, %35, %57 : vector<8x1xi1>, vector<8x1xf32>
      %cst_26 = arith.constant dense<0.000000e+00> : vector<1xf32>
      %59 = vector.multi_reduction <add>, %58, %cst_26 [0] : vector<8x1xf32> to vector<1xf32>
      %60 = vector.shape_cast %59 : vector<1xf32> to vector<1x1xf32>
      %61 = arith.addf %56, %60 : vector<1x1xf32>
      %c0_27 = arith.constant 0 : index
      %c0_28 = arith.constant 0 : index
      %62 = vector.load %arg10[%c0_27, %c0_28] : memref<1x1xf32, #tpu.memory_space<vmem>>, vector<1x1xf32>
      tpu.vector_store %arg10[%c0_27, %c0_28], %61 {strides = array<i32>} : memref<1x1xf32, #tpu.memory_space<vmem>>, vector<1x1xf32>,
      %c0_29 = arith.constant 0 : index
      %c0_30 = arith.constant 0 : index
      %63 = vector.load %arg11[%c0_29, %c0_30] : memref<1x1xf32, #tpu.memory_space<vmem>>, vector<1x1xf32>
      %cst_31 = arith.constant 0.000000e+00 : f32
      %64 = vector.broadcast %cst_31 : f32 to vector<8x1xf32>
      %65 = arith.select %55, %42, %64 : vector<8x1xi1>, vector<8x1xf32>
      %cst_32 = arith.constant dense<0.000000e+00> : vector<1xf32>
      %66 = vector.multi_reduction <add>, %65, %cst_32 [0] : vector<8x1xf32> to vector<1xf32>
      %67 = vector.shape_cast %66 : vector<1xf32> to vector<1x1xf32>
      %68 = arith.addf %63, %67 : vector<1x1xf32>
      %c0_33 = arith.constant 0 : index
      %c0_34 = arith.constant 0 : index
      %69 = vector.load %arg11[%c0_33, %c0_34] : memref<1x1xf32, #tpu.memory_space<vmem>>, vector<1x1xf32>
      tpu.vector_store %arg11[%c0_33, %c0_34], %68 {strides = array<i32>} : memref<1x1xf32, #tpu.memory_space<vmem>>, vector<1x1xf32>,
      %c0_35 = arith.constant 0 : index
      %70 = memref.load %arg1[%c0_35] : memref<1xi32, #tpu.memory_space<smem>>
      %71 = arith.sitofp %70 : i32 to f32
      %c0_36 = arith.constant 0 : index
      %c0_37 = arith.constant 0 : index
      %72 = vector.load %arg10[%c0_36, %c0_37] : memref<1x1xf32, #tpu.memory_space<vmem>>, vector<1x1xf32>
      %73 = vector.broadcast %71 : f32 to vector<1x1xf32>
      %74 = arith.divf %72, %73 : vector<1x1xf32>
      %c0_38 = arith.constant 0 : index
      %c0_39 = arith.constant 0 : index
      %75 = vector.load %arg11[%c0_38, %c0_39] : memref<1x1xf32, #tpu.memory_space<vmem>>, vector<1x1xf32>
      %76 = vector.broadcast %71 : f32 to vector<1x1xf32>
      %77 = arith.divf %75, %76 : vector<1x1xf32>
      %78 = math.log %77 : vector<1x1xf32>
      %79 = arith.subf %74, %78 : vector<1x1xf32>
      %cst_40 = arith.constant 0.000000e+00 : f32
      %80 = vector.broadcast %cst_40 : f32 to vector<1x1xf32>
      %81 = arith.subf %80, %79 : vector<1x1xf32>
      %c0_41 = arith.constant 0 : index
      %c0_42 = arith.constant 0 : index
      %82 = vector.load %arg9[%c0_41, %c0_42] : memref<1x1xf32, #tpu.memory_space<vmem>>, vector<1x1xf32>
      tpu.vector_store %arg9[%c0_41, %c0_42], %81 {strides = array<i32>} : memref<1x1xf32, #tpu.memory_space<vmem>>, vector<1x1xf32>,
    } else {
    }
    return
  }
  func.func @transform_0(%arg0: i32, %arg1: memref<1xi32, #tpu.memory_space<smem>>) -> (i32, i32) {
    %c0_i32 = arith.constant 0 : i32
    %c0_i32_0 = arith.constant 0 : i32
    return %arg0, %c0_i32 : i32, i32
  }
  func.func @transform_1(%arg0: i32, %arg1: memref<1xi32, #tpu.memory_space<smem>>) -> (i32, i32) {
    %c0_i32 = arith.constant 0 : i32
    %c0_i32_0 = arith.constant 0 : i32
    return %arg0, %c0_i32 : i32, i32
  }
  func.func @transform_2(%arg0: i32, %arg1: memref<1xi32, #tpu.memory_space<smem>>) -> (i32, i32) {
    %c0_i32 = arith.constant 0 : i32
    %c0_i32_0 = arith.constant 0 : i32
    return %arg0, %c0_i32 : i32, i32
  }
  func.func @transform_3(%arg0: i32, %arg1: memref<1xi32, #tpu.memory_space<smem>>) -> (i32, i32) {
    %c0_i32 = arith.constant 0 : i32
    %c0_i32_0 = arith.constant 0 : i32
    %c0_i32_1 = arith.constant 0 : i32
    return %c0_i32, %c0_i32_0 : i32, i32
  }
  func.func @transform_4(%arg0: i32, %arg1: memref<1xi32, #tpu.memory_space<smem>>) -> (i32, i32) {
    %c0_i32 = arith.constant 0 : i32
    %c0_i32_0 = arith.constant 0 : i32
    %c0_i32_1 = arith.constant 0 : i32
    return %c0_i32, %c0_i32_0 : i32, i32
  }
  func.func @transform_5(%arg0: i32, %arg1: memref<1xi32, #tpu.memory_space<smem>>) -> (i32, i32) {
    %c0_i32 = arith.constant 0 : i32
    %c0_i32_0 = arith.constant 0 : i32
    %c0_i32_1 = arith.constant 0 : i32
    return %c0_i32, %c0_i32_0 : i32, i32
  }
  func.func @transform_6(%arg0: i32, %arg1: memref<1xi32, #tpu.memory_space<smem>>) -> (i32, i32) {
    %c0_i32 = arith.constant 0 : i32
    %c0_i32_0 = arith.constant 0 : i32
    %c0_i32_1 = arith.constant 0 : i32
    return %c0_i32, %c0_i32_0 : i32, i32
  }
  func.func @transform_7(%arg0: i32, %arg1: memref<1xi32, #tpu.memory_space<smem>>) -> (i32, i32) {
    %c0_i32 = arith.constant 0 : i32
    %c0_i32_0 = arith.constant 0 : i32
    %c0_i32_1 = arith.constant 0 : i32
    return %c0_i32, %c0_i32_0 : i32, i32
  }
}

</mosaic_0001>

<bundles_post_ra>
// kernel: tpu_custom_call.1
= control target key start
LH: loop header
LB: loop body
LE: loop exit
PB: predicated region body
PF: predicated region fallthrough
CT: control target
= control target key end

     0   :  { %s332_s0 = inlined_call_operand.<no memory space> [shape: s32[1], index: 0, kind: input, shape index: {}]   ;;  %s333_s1 = inlined_call_operand.vmem [shape: f32[8,1], index: 1, kind: input, shape index: {}]   ;;  %s334_s2 = inlined_call_operand.vmem [shape: f32[8,1], index: 2, kind: input, shape index: {}]   ;;  %s335_s3 = inlined_call_operand.vmem [shape: f32[8,1], index: 3, kind: input, shape index: {}]   ;;  %s336_s4 = inlined_call_operand.vmem [shape: f32[2,128], index: 4, kind: input, shape index: {}]   ;;  %s337_s5 = inlined_call_operand.vmem [shape: f32[1,128], index: 5, kind: input, shape index: {}]   ;;  %s338_s6 = inlined_call_operand.vmem [shape: f32[1,128], index: 6, kind: input, shape index: {}]   ;;  %s339_s7 = inlined_call_operand.<no memory space> [shape: f32[1,1], index: 7, kind: input, shape index: {}]   ;;  %s340_s8 = inlined_call_operand.hbm [shape: f32[1,1], index: 8, kind: output, shape index: {}]  }
   0x1   :  { %v14_v0 = vstv %s339_s7 }
   0x2   :  { %15 = vst [vmem:[#allocation6] sm:$0x1] %v14_v0 }
   0x3   :  { %v39_v1 = vld [vmem:[%s334_s2] sm:$0xff]  ;;  %v236_v3 = vmov 0  }
   0x4   :  { %v38_v2 = vld [vmem:[%s333_s1] sm:$0xff]  ;;  %198 = vset.pattern.permute.xlu1 %v236_v3  ;;  %197 = vset.pattern.permute.xlu0 %v236_v3 }
   0x5   :  { %55 = vperm.xlu1 %198, %v39_v1   ;;  %48 = vperm.xlu0 %197, %v38_v2  }
   0x6   :  { %16 = vsyncpa [#allocation8], 0  ;;  %v40_v4 = vld [vmem:[%s335_s3] sm:$0xff]  ;;  %vm35_vm0 = vcmask 0   ;;  %v237_v23 = vmov 0.0   ;;  %v120_v24 = vlaneseq  ;;  %v126_v27 = vstv %s332_s0  ;;  %s153_s18 = scvt.s32.f32 %s332_s0  ;;  %s238_s0 = smov [#allocation7]  }
   0x7   :  { %v199_v5 = vld [vmem:[%s336_s4 + $0x1] ss:$0 sm:$0xff]  ;;  %v200_v6 = vld [vmem:[%s336_s4] ss:$0 sm:$0xff]  ;;  %36 = vst.msk [vmem:[#allocation2] sm:$0x1] %vm35_vm0, %v237_v23 }
   0x8   :  { %v201_v11 = vld [vmem:[%s337_s5] ss:$0 sm:$0xff]  ;;  %37 = vst.msk [vmem:[#allocation3] sm:$0x1] %vm35_vm0, %v237_v23  ;;  %v121_v25 = vshrl.u32 %v120_v24, 7  ;;  %vm130_vm2 = vcmask 7168   ;;  %v155_v40 = vstv %s153_s18 }
   0x9   :  { %v202_v14 = vld [vmem:[%s338_s6] ss:$0 sm:$0xff]  ;;  %v203_v26 = vld [vmem:[#allocation6] ss:$0 sm:$0xff]  ;;  %vm161_vm3 = vweird.f32 %v155_v40  ;;  %v167_v60 = vand.u32 2147483648, %v155_v40  ;;  %s183_s19 = sshll.u32 %s238_s0, 4  ;;  %s184_s19 = int_to_ptr.vmem [resolvable:$true] %s183_s19 }
   0xa   :  { %vm313_vm1 = vcmp.lt.s32.totalorder %v121_v25, %v126_v27  ;;  %v165_v62 = vand.u32 2147483647, %v155_v40  ;;  %s185_s22 = sshll.u32 %s340_s8, 4  ;;  %s186_s22 = int_to_ptr.hbm [resolvable:$true] %s185_s22 }
   0xb   :  { %v168_v63 = vor.u32 1.1754944e-38, %v167_v60 }
   0xc   :  { %vm166_vm6 = vcmp.eq.f32.partialorder %v165_v62, 8.507059e+37 }
   0xd   :  { %68 = vperm.xlu0 %197, %v40_v4  }
   0xe   :  { %v128_v42 = vld [vmem:[#allocation2] sm:$0x1] }
   0xf   :  { %v141_v56 = vld [vmem:[#allocation3] sm:$0x1] }
  0x77   :  { %v56_v7 = vpop.permute.xlu1 %55  ;;  %v49_v8 = vpop.permute.xlu0 %48 }
  0x78   :  { %v59_v9 = vmul.f32 %v199_v5, %v56_v7  ;;  %v52_v10 = vmul.f32 %v200_v6, %v49_v8 }
  0x7a   :  { %v60_v12 = vadd.f32 %v59_v9, %v52_v10 }
  0x7c   :  { %v64_v13 = vadd.f32 %v201_v11, %v60_v12 }
  0x7e   :  { %v65_v15 = vmax.f32 %v64_v13, 0.0 }
  0x7f   :  { %v69_v16 = vpop.permute.xlu0 %68 }
  0x80   :  { %v71_v17 = vmul.f32 %v199_v5, %v69_v16  ;;  %v78_v18 = vmul.f32 %v202_v14, %v65_v15 }
  0x82   :  { %v72_v19 = vadd.f32 %v71_v17, %v52_v10  ;;  %79 = vadd.xlane.f32.xlu2 %v78_v18 }
  0x84   :  { %v73_v20 = vadd.f32 %v201_v11, %v72_v19 }
  0x86   :  { %v74_v21 = vmax.f32 %v73_v20, 0.0 }
  0x88   :  { %v85_v22 = vmul.f32 %v202_v14, %v74_v21 }
  0x8a   :  { %86 = vadd.xlane.f32.xlu1 %v85_v22 }
  0xf5   :  { %v80_v29 = vpop.xlane.xlu2 %79 }
  0xf6   :  { %v84_v30 = vadd.f32 %v203_v26, %v80_v29 }
  0xf8   :  { %v129_v31 = vsel %vm313_vm1, %v84_v30, 0.0 }
  0xf9   :  { %v131_v32 = vsel %vm130_vm2, %v129_v31, 0.0 }
  0xfa   :  { %v132_v33 = vrot.slane %v131_v32, 4 }
  0xfc   :  { %v133_v34 = vadd.f32 %v132_v33, %v131_v32 }
  0xfd   :  { %v87_v35 = vpop.xlane.xlu1 %86 }
  0xfe   :  { %v134_v36 = vrot.slane %v133_v34, 2  ;;  %v88_v37 = vadd.f32 %v203_v26, %v87_v35 }
 0x100   :  { %v135_v38 = vadd.f32 %v134_v36, %v133_v34  ;;  %v89_v39 = vmul.f32 1.442695, %v88_v37 }
 0x102   :  { %v136_v41 = vrot.slane %v135_v38, 1  ;;  %204 = vpow2.f32 %v89_v39 }
 0x103   :  { %206 = vrcp.f32 %v155_v40 }
 0x104   :  { %v137_v43 = vadd.f32 %v136_v41, %v135_v38 }
 0x106   :  { %v138_v44 = vadd.f32 %v137_v43, %v128_v42 }
 0x108   :  { %v205_v45 = vpop.eup %204  ;;  %140 = vst.msk [vmem:[#allocation2] sm:$0x1] %vm35_vm0, %v138_v44 }
 0x109   :  { %v142_v46 = vsel %vm313_vm1, %v205_v45, 0.0  ;;  %v207_v47 = vpop.eup %206 }
 0x10a   :  { %v143_v48 = vsel %vm130_vm2, %v142_v46, 0.0  ;;  %v157_v51 = vmul.f32 %v207_v47, %v155_v40  ;;  %vm162_vm4 = vweird.f32 %v207_v47 }
 0x10b   :  { %v144_v49 = vrot.slane %v143_v48, 4  ;;  %vm163_vm5 = vmor %vm161_vm3, %vm162_vm4 }
 0x10c   :  { %v158_v54 = vsub.f32 1.0, %v157_v51 }
 0x10d   :  { %v145_v50 = vadd.f32 %v144_v49, %v143_v48 }
 0x10e   :  { %v159_v58 = vmul.f32 %v207_v47, %v158_v54 }
 0x10f   :  { %v146_v52 = vrot.slane %v145_v50, 2  ;;  %v154_v4 = vld [vmem:[#allocation2] sm:$0x1] }
 0x110   :  { %v160_v61 = vadd.f32 %v207_v47, %v159_v58 }
 0x111   :  { %v147_v53 = vadd.f32 %v146_v52, %v145_v50 }
 0x112   :  { %v164_v0 = vsel %vm163_vm5, %v207_v47, %v160_v61 }
 0x113   :  { %v148_v55 = vrot.slane %v147_v53, 1  ;;  %v169_v1 = vsel %vm166_vm6, %v168_v63, %v164_v0 }
 0x114   :  { %v170_v6 = vmul.f32 %v169_v1, %v154_v4 }
 0x115   :  { %v149_v57 = vadd.f32 %v148_v55, %v147_v53 }
 0x117   :  { %v150_v59 = vadd.f32 %v149_v57, %v141_v56 }
 0x119   :  { %151 = vst.msk [vmem:[#allocation3] sm:$0x1] %vm35_vm0, %v150_v59 }
 0x120   :  { %v171_v2 = vld [vmem:[#allocation3] sm:$0x1] }
 0x121   :  { %v172_v3 = vmul.f32 %v171_v2, %v169_v1 }
 0x123   :  { %208 = vlog2.f32 %v172_v3 }
 0x129   :  { %v209_v5 = vpop.eup %208 }
 0x12a   :  { %v174_v7 = vmul.f32 0.6931472, %v209_v5 }
 0x12c   :  { %v175_v8 = vsub.f32 %v170_v6, %v174_v7 }
 0x12e   :  { %v176_v9 = vsub.f32 0.0, %v175_v8 }
 0x130   :  { %177 = vst.msk [vmem:[#allocation7] sm:$0x1] %vm35_vm0, %v176_v9 }
 0x131   :  { %188 = dma.vmem_to_hbm [thread:$0]  %s184_s19, 16, %s186_s22, [#allocation8]  }
 0x132   :  { %234 = dma.done.wait [#allocation8], 16  }
 0x133   :  { %235 = vsyncadd [#allocation8], 4294967280 }
 0x134   :  { %193 = vsyncpa [#allocation8], 1 }

</bundles_post_ra>
